<compile_context>
chip_gen: v7x
topology: tpu7x:2x2x1
jax: 0.10.0
libtpu: 0.0.40
codegen_flags: <defaults>
</compile_context>

<pallas_src>
import jax
import jax.numpy as jnp
from jax.experimental import pallas as pl
from jax.experimental.pallas import tpu as pltpu

LANE = 128


def _make_pool_kernel(n_chunks, n_full_tail, rem_partial, hw):
    """Fused max/avg channel pooling over (Bt, C, tile_hw) blocks.

    n_chunks     : 128-lane chunks per (full) spatial tile.
    n_full_tail  : fully in-bounds chunks in the LAST spatial tile.
    rem_partial  : valid lanes in the partial tail chunk (0 => none).
    hw           : true spatial size H*W (for the mean).
    """
    inv_hw = 1.0 / float(hw)
    main_unroll = min(8, max(1, n_chunks))
    tail_unroll = min(8, max(1, n_full_tail))

    def load_chunk(x_ref, j):
        off = pl.multiple_of(j * LANE, LANE)
        return x_ref[:, :, pl.ds(off, LANE)].astype(jnp.float32)

    def kernel(x_ref, out_ref, max_acc, sum_acc):
        k = pl.program_id(1)
        last = pl.num_programs(1) - 1

        @pl.when(k == 0)
        def _init():
            max_acc[...] = jnp.full(max_acc.shape, -jnp.inf, jnp.float32)
            sum_acc[...] = jnp.zeros(sum_acc.shape, jnp.float32)

        # ---- hot path: every tile except the last one is fully in-bounds ----
        @pl.when(k != last)
        def _main():
            def body(j, carry):
                m, s = carry
                c = load_chunk(x_ref, j)
                return jnp.maximum(m, c), s + c

            m, s = jax.lax.fori_loop(
                0, n_chunks, body, (max_acc[...], sum_acc[...]),
                unroll=main_unroll)
            # One acc load + one acc store per grid step (not per chunk).
            max_acc[...] = m
            sum_acc[...] = s

        # ---- last tile: statically-known tail handling + finalize ----
        @pl.when(k == last)
        def _tail_and_finalize():
            m = max_acc[...]
            s = sum_acc[...]

            if n_full_tail > 0:
                def body(j, carry):
                    mm, ss = carry
                    c = load_chunk(x_ref, j)
                    return jnp.maximum(mm, c), ss + c

                m, s = jax.lax.fori_loop(0, n_full_tail, body, (m, s),
                                         unroll=tail_unroll)

            if rem_partial > 0:
                # Only the single statically-known partial chunk is masked;
                # both max AND sum are masked (no host-side zero padding).
                c = load_chunk(x_ref, n_full_tail)
                lane = jax.lax.broadcasted_iota(jnp.int32, c.shape, 2)
                valid = lane < rem_partial
                m = jnp.maximum(m, jnp.where(valid, c, -jnp.inf))
                s = s + jnp.where(valid, c, jnp.float32(0.0))

            # Single cross-lane (XLU) reduce per batch block.
            mx = jnp.max(m, axis=-1)                 # (Bt, C)
            av = jnp.sum(s, axis=-1) * inv_hw        # (Bt, C)
            out_ref[:, 0:1, :] = mx[:, None, :]
            out_ref[:, 1:2, :] = av[:, None, :]

    return kernel


def _choose_tiling(B, C, HW, itemsize, block_budget_bytes):
    """Pick (Bt, tile_hw): Bt divides B, tile_hw is a multiple of 128."""
    hw_chunks = pl.cdiv(HW, LANE)            # total 128-lane chunks
    chunk_row_bytes = C * LANE * itemsize    # one chunk for one batch row

    divisors = [d for d in range(1, B + 1) if B % d == 0]
    # (a) minimal (single-chunk) block must fit the per-block budget.
    fits = [d for d in divisors if d * chunk_row_bytes <= block_budget_bytes] or [1]
    # (b) keep register-resident f32 accumulators modest (2*Bt*C/8 vregs).
    light = [d for d in fits if d * C <= 128] or fits
    # (c) leave the parallel batch grid axis extent >= 2 when possible so a
    #     dual-TC chip (v7x) gets work on both TensorCores.
    par = [d for d in light if d <= B // 2]
    Bt = max(par) if par else max(light)

    n_chunks = max(1, min(hw_chunks, block_budget_bytes // (Bt * chunk_row_bytes)))
    tile_hw = n_chunks * LANE
    return Bt, tile_hw


def channel_attention(x_nchw, w1, w2, *, block_budget_bytes=4 * 1024 * 1024):
    """CBAM ChannelAttention forward.

    x_nchw: (B, C, H, W); w1: (Cr, C); w2: (C, Cr). Returns (B, C, 1, 1).
    """
    B, C, H, W = x_nchw.shape
    HW = H * W
    itemsize = jnp.dtype(x_nchw.dtype).itemsize

    Bt, tile_hw = _choose_tiling(B, C, HW, itemsize, block_budget_bytes)
    n_chunks = tile_hw // LANE
    K = pl.cdiv(HW, tile_hw)
    last_len = HW - (K - 1) * tile_hw        # valid lanes in the last tile
    n_full_tail = last_len // LANE
    rem_partial = last_len % LANE

    x = x_nchw.reshape(B, C, HW)             # free reshape; no padded HBM copy

    kernel = _make_pool_kernel(n_chunks, n_full_tail, rem_partial, HW)

    # Raise the scoped-VMEM limit only if the derived blocks actually need it
    # (double-buffered input + accumulators + outputs + headroom).
    in_block_bytes = Bt * C * tile_hw * itemsize
    acc_bytes = 2 * Bt * C * LANE * 4
    out_bytes = 2 * Bt * 2 * C * 4
    needed = 2 * in_block_bytes + acc_bytes + out_bytes + (4 << 20)
    compiler_kwargs = dict(dimension_semantics=("parallel", "arbitrary"))
    if needed > (16 << 20):                  # smallest scoped-VMEM default (v5e)
        compiler_kwargs["vmem_limit_bytes"] = int(needed)
    # TODO(synk): for C large enough that a single (1, C, 128) block overflows
    # VMEM, a channel-split parallel grid axis would be needed as well.

    pooled = pl.pallas_call(
        kernel,
        out_shape=jax.ShapeDtypeStruct((B, 2, C), jnp.float32),
        grid_spec=pltpu.PrefetchScalarGridSpec(
            num_scalar_prefetch=0,
            grid=(B // Bt, K),
            in_specs=[
                pl.BlockSpec((Bt, C, tile_hw), lambda b, k: (b, 0, k)),
            ],
            out_specs=pl.BlockSpec((Bt, 2, C), lambda b, k: (b, 0, 0)),
            scratch_shapes=[
                pltpu.VMEM((Bt, C, LANE), jnp.float32),   # running max
                pltpu.VMEM((Bt, C, LANE), jnp.float32),   # running sum
            ],
        ),
        compiler_params=pltpu.CompilerParams(**compiler_kwargs),
    )(x)

    # Tiny SE MLP + sigmoid: with Cr = C/16 it is >99% MXU padding, so it is
    # cheaper as one batched XLA matmul pair than as an in-kernel epilogue.
    mx = pooled[:, 0, :]
    av = pooled[:, 1, :]
    stats = jnp.concatenate([mx, av], axis=0)                       # (2B, C)
    h = jnp.maximum(stats @ w1.T.astype(jnp.float32), 0.0)          # (2B, Cr)
    y = h @ w2.T.astype(jnp.float32)                                # (2B, C)
    out = jax.nn.sigmoid(y[:B] + y[B:]).astype(x_nchw.dtype)        # (B, C)
    return out.reshape(B, C, 1, 1)


def channel_attention_ref(x, w1, w2):
    """Pure-JAX reference mirroring the PyTorch forward (NCHW)."""
    mx = jnp.max(x, axis=(2, 3))    # (B, C)
    av = jnp.mean(x, axis=(2, 3))   # (B, C)

    def se(v):
        h = jnp.maximum(v @ w1.T, 0.0)
        return h @ w2.T

    return jax.nn.sigmoid(se(mx) + se(av))[:, :, None, None]


if __name__ == "__main__":
    B, C, H, W = 2, 64, 16, 16
    reduction = 16
    Cr = C // reduction

    key = jax.random.PRNGKey(0)
    kx, k1, k2 = jax.random.split(key, 3)
    x = jax.random.normal(kx, (B, C, H, W), dtype=jnp.float32)
    # Deterministic kaiming-like init for the two bias-free 1x1 convs.
    w1 = jax.random.normal(k1, (Cr, C), dtype=jnp.float32) * (2.0 / C) ** 0.5   # Conv2d(C,  Cr, 1)
    w2 = jax.random.normal(k2, (C, Cr), dtype=jnp.float32) * (2.0 / Cr) ** 0.5  # Conv2d(Cr, C,  1)

    out = channel_attention(x, w1, w2)
    jax.block_until_ready(out)
    ref = channel_attention_ref(x, w1, w2)
    assert out.shape == (B, C, 1, 1)
    assert jnp.allclose(out, ref, atol=1e-5, rtol=1e-5), "mismatch (divisible HW)"

    # Ragged spatial size (HW = 135, not a multiple of 128): exercises the
    # in-kernel tail masking with no host-side padding.
    x2 = jax.random.normal(k1, (B, C, 15, 9), dtype=jnp.float32)
    out2 = channel_attention(x2, w1, w2)
    jax.block_until_ready(out2)
    ref2 = channel_attention_ref(x2, w1, w2)
    assert jnp.allclose(out2, ref2, atol=1e-5, rtol=1e-5), "mismatch (ragged HW)"

    # Multi-step spatial grid (tiny block budget forces K > 1): exercises the
    # running-accumulator carry across grid steps plus a partial tail chunk.
    x3 = jax.random.normal(k2, (B, C, 9, 33), dtype=jnp.float32)
    out3 = channel_attention(x3, w1, w2, block_budget_bytes=C * LANE * 4)
    jax.block_until_ready(out3)
    ref3 = channel_attention_ref(x3, w1, w2)
    assert jnp.allclose(out3, ref3, atol=1e-5, rtol=1e-5), "mismatch (multi-tile HW)"

    print("KERNEL_OK")
</pallas_src>

<mosaic_0001>
module attributes {stable_mosaic.version = 11 : i64} {
  func.func @kernel(%arg0: i32, %arg1: i32, %arg2: memref<1x64x256xf32, #tpu.memory_space<vmem>>, %arg3: memref<1x2x64xf32, #tpu.memory_space<vmem>>, %arg4: memref<1x64x128xf32, #tpu.memory_space<vmem>>, %arg5: memref<1x64x128xf32, #tpu.memory_space<vmem>>) attributes {dimension_semantics = [#tpu.dimension_semantics<parallel>, #tpu.dimension_semantics<arbitrary>], iteration_bounds = array<i64: 2, 1>, scalar_prefetch = 0 : i64, scratch_operands = 2 : i64, tpu.core_type = #tpu.core_type<tc>, window_params = [{transform_indices = @transform_0, window_bounds = array<i64: 1, 64, 256>}, {transform_indices = @transform_1, window_bounds = array<i64: 1, 2, 64>}]} {
    %c0_i32 = arith.constant 0 : i32
    %0 = arith.cmpi eq, %arg1, %c0_i32 : i32
    %1 = arith.extui %0 : i1 to i32
    %c0_i32_0 = arith.constant 0 : i32
    %2 = arith.cmpi ne, %1, %c0_i32_0 : i32
    scf.if %2 {
      %cst = arith.constant 0xFF800000 : f32
      %9 = vector.broadcast %cst : f32 to vector<1x64x128xf32>
      %c0 = arith.constant 0 : index
      %c0_5 = arith.constant 0 : index
      %c0_6 = arith.constant 0 : index
      %10 = vector.load %arg4[%c0, %c0_5, %c0_6] : memref<1x64x128xf32, #tpu.memory_space<vmem>>, vector<1x64x128xf32>
      tpu.vector_store %arg4[%c0, %c0_5, %c0_6], %9 {strides = array<i32>} : memref<1x64x128xf32, #tpu.memory_space<vmem>>, vector<1x64x128xf32>,
      %cst_7 = arith.constant 0.000000e+00 : f32
      %11 = vector.broadcast %cst_7 : f32 to vector<1x64x128xf32>
      %c0_8 = arith.constant 0 : index
      %c0_9 = arith.constant 0 : index
      %c0_10 = arith.constant 0 : index
      %12 = vector.load %arg5[%c0_8, %c0_9, %c0_10] : memref<1x64x128xf32, #tpu.memory_space<vmem>>, vector<1x64x128xf32>
      tpu.vector_store %arg5[%c0_8, %c0_9, %c0_10], %11 {strides = array<i32>} : memref<1x64x128xf32, #tpu.memory_space<vmem>>, vector<1x64x128xf32>,
    } else {
    }
    %c0_i32_1 = arith.constant 0 : i32
    %3 = arith.cmpi ne, %arg1, %c0_i32_1 : i32
    %4 = arith.extui %3 : i1 to i32
    %c0_i32_2 = arith.constant 0 : i32
    %5 = arith.cmpi ne, %4, %c0_i32_2 : i32
    scf.if %5 {
      %c0 = arith.constant 0 : index
      %c0_5 = arith.constant 0 : index
      %c0_6 = arith.constant 0 : index
      %9 = vector.load %arg4[%c0, %c0_5, %c0_6] : memref<1x64x128xf32, #tpu.memory_space<vmem>>, vector<1x64x128xf32>
      %c0_7 = arith.constant 0 : index
      %c0_8 = arith.constant 0 : index
      %c0_9 = arith.constant 0 : index
      %10 = vector.load %arg5[%c0_7, %c0_8, %c0_9] : memref<1x64x128xf32, #tpu.memory_space<vmem>>, vector<1x64x128xf32>
      %c0_i32_10 = arith.constant 0 : i32
      %c128_i32 = arith.constant 128 : i32
      %11 = arith.muli %c0_i32_10, %c128_i32 : i32
      %12 = tpu.assume_multiple %11, 128 : i32
      %c0_11 = arith.constant 0 : index
      %c0_12 = arith.constant 0 : index
      %13 = arith.index_cast %12 : i32 to index
      %14 = vector.load %arg2[%c0_11, %c0_12, %13] : memref<1x64x256xf32, #tpu.memory_space<vmem>>, vector<1x64x128xf32>
      %15 = arith.maximumf %9, %14 : vector<1x64x128xf32>
      %16 = arith.addf %10, %14 : vector<1x64x128xf32>
      %c1_i32 = arith.constant 1 : i32
      %c128_i32_13 = arith.constant 128 : i32
      %17 = arith.muli %c1_i32, %c128_i32_13 : i32
      %18 = tpu.assume_multiple %17, 128 : i32
      %c0_14 = arith.constant 0 : index
      %c0_15 = arith.constant 0 : index
      %19 = arith.index_cast %18 : i32 to index
      %20 = vector.load %arg2[%c0_14, %c0_15, %19] : memref<1x64x256xf32, #tpu.memory_space<vmem>>, vector<1x64x128xf32>
      %21 = arith.maximumf %15, %20 : vector<1x64x128xf32>
      %22 = arith.addf %16, %20 : vector<1x64x128xf32>
      %c2_i32 = arith.constant 2 : i32
      %c0_16 = arith.constant 0 : index
      %c0_17 = arith.constant 0 : index
      %c0_18 = arith.constant 0 : index
      %23 = vector.load %arg4[%c0_16, %c0_17, %c0_18] : memref<1x64x128xf32, #tpu.memory_space<vmem>>, vector<1x64x128xf32>
      tpu.vector_store %arg4[%c0_16, %c0_17, %c0_18], %21 {strides = array<i32>} : memref<1x64x128xf32, #tpu.memory_space<vmem>>, vector<1x64x128xf32>,
      %c0_19 = arith.constant 0 : index
      %c0_20 = arith.constant 0 : index
      %c0_21 = arith.constant 0 : index
      %24 = vector.load %arg5[%c0_19, %c0_20, %c0_21] : memref<1x64x128xf32, #tpu.memory_space<vmem>>, vector<1x64x128xf32>
      tpu.vector_store %arg5[%c0_19, %c0_20, %c0_21], %22 {strides = array<i32>} : memref<1x64x128xf32, #tpu.memory_space<vmem>>, vector<1x64x128xf32>,
    } else {
    }
    %c0_i32_3 = arith.constant 0 : i32
    %6 = arith.cmpi eq, %arg1, %c0_i32_3 : i32
    %7 = arith.extui %6 : i1 to i32
    %c0_i32_4 = arith.constant 0 : i32
    %8 = arith.cmpi ne, %7, %c0_i32_4 : i32
    scf.if %8 {
      %c0 = arith.constant 0 : index
      %c0_5 = arith.constant 0 : index
      %c0_6 = arith.constant 0 : index
      %9 = vector.load %arg4[%c0, %c0_5, %c0_6] : memref<1x64x128xf32, #tpu.memory_space<vmem>>, vector<1x64x128xf32>
      %c0_7 = arith.constant 0 : index
      %c0_8 = arith.constant 0 : index
      %c0_9 = arith.constant 0 : index
      %10 = vector.load %arg5[%c0_7, %c0_8, %c0_9] : memref<1x64x128xf32, #tpu.memory_space<vmem>>, vector<1x64x128xf32>
      %c0_i32_10 = arith.constant 0 : i32
      %c128_i32 = arith.constant 128 : i32
      %11 = arith.muli %c0_i32_10, %c128_i32 : i32
      %12 = tpu.assume_multiple %11, 128 : i32
      %c0_11 = arith.constant 0 : index
      %c0_12 = arith.constant 0 : index
      %13 = arith.index_cast %12 : i32 to index
      %14 = vector.load %arg2[%c0_11, %c0_12, %13] : memref<1x64x256xf32, #tpu.memory_space<vmem>>, vector<1x64x128xf32>
      %15 = arith.maximumf %9, %14 : vector<1x64x128xf32>
      %16 = arith.addf %10, %14 : vector<1x64x128xf32>
      %c1_i32 = arith.constant 1 : i32
      %c128_i32_13 = arith.constant 128 : i32
      %17 = arith.muli %c1_i32, %c128_i32_13 : i32
      %18 = tpu.assume_multiple %17, 128 : i32
      %c0_14 = arith.constant 0 : index
      %c0_15 = arith.constant 0 : index
      %19 = arith.index_cast %18 : i32 to index
      %20 = vector.load %arg2[%c0_14, %c0_15, %19] : memref<1x64x256xf32, #tpu.memory_space<vmem>>, vector<1x64x128xf32>
      %21 = arith.maximumf %15, %20 : vector<1x64x128xf32>
      %22 = arith.addf %16, %20 : vector<1x64x128xf32>
      %c2_i32 = arith.constant 2 : i32
      %cst = arith.constant dense<0xFF800000> : vector<1x64xf32>
      %23 = vector.multi_reduction <maximumf>, %21, %cst [2] : vector<1x64x128xf32> to vector<1x64xf32>
      %cst_16 = arith.constant dense<0.000000e+00> : vector<1x64xf32>
      %24 = vector.multi_reduction <add>, %22, %cst_16 [2] : vector<1x64x128xf32> to vector<1x64xf32>
      %cst_17 = arith.constant 3.906250e-03 : f32
      %25 = vector.broadcast %cst_17 : f32 to vector<1x64xf32>
      %26 = arith.mulf %24, %25 : vector<1x64xf32>
      %27 = vector.shape_cast %23 : vector<1x64xf32> to vector<1x1x64xf32>
      %c0_18 = arith.constant 0 : index
      %c0_19 = arith.constant 0 : index
      %c0_20 = arith.constant 0 : index
      %28 = vector.load %arg3[%c0_18, %c0_19, %c0_20] : memref<1x2x64xf32, #tpu.memory_space<vmem>>, vector<1x1x64xf32>
      tpu.vector_store %arg3[%c0_18, %c0_19, %c0_20], %27 {strides = array<i32>} : memref<1x2x64xf32, #tpu.memory_space<vmem>>, vector<1x1x64xf32>,
      %29 = vector.shape_cast %26 : vector<1x64xf32> to vector<1x1x64xf32>
      %c0_21 = arith.constant 0 : index
      %c1 = arith.constant 1 : index
      %c0_22 = arith.constant 0 : index
      %30 = vector.load %arg3[%c0_21, %c1, %c0_22] : memref<1x2x64xf32, #tpu.memory_space<vmem>>, vector<1x1x64xf32>
      tpu.vector_store %arg3[%c0_21, %c1, %c0_22], %29 {strides = array<i32>} : memref<1x2x64xf32, #tpu.memory_space<vmem>>, vector<1x1x64xf32>,
    } else {
    }
    return
  }
  func.func @transform_0(%arg0: i32, %arg1: i32) -> (i32, i32, i32) {
    %c0_i32 = arith.constant 0 : i32
    %c0_i32_0 = arith.constant 0 : i32
    return %arg0, %c0_i32, %arg1 : i32, i32, i32
  }
  func.func @transform_1(%arg0: i32, %arg1: i32) -> (i32, i32, i32) {
    %c0_i32 = arith.constant 0 : i32
    %c0_i32_0 = arith.constant 0 : i32
    %c0_i32_1 = arith.constant 0 : i32
    return %arg0, %c0_i32, %c0_i32_0 : i32, i32, i32
  }
}

</mosaic_0001>

<bundles_post_ra>
// kernel: tpu_custom_call.1
= control target key start
LH: loop header
LB: loop body
LE: loop exit
PB: predicated region body
PF: predicated region fallthrough
CT: control target
= control target key end

     0   :  { %6 = vsyncpa [#allocation5], 0  ;;  %s1009_s0 = inlined_call_operand.hbm [shape: f32[2,64,256], index: 0, kind: input, shape index: {}]   ;;  %s1010_s1 = inlined_call_operand.hbm [shape: f32[2,2,64], index: 1, kind: output, shape index: {}]  }
   0x1   :  { %8 = vsyncpa [#allocation5 + $0x1], 0 }
   0x2   :  { %9 = vsyncpa [#allocation6], 0 }
   0x3   :  { %11 = vsyncpa [#allocation6 + $0x1], 0  ;;  %s798_s6 = smov 0   ;;  %s800_s7 = smov 0  }
   0x4   :  { %s802_s8 = smov 0   ;;  %s804_s9 = smov 0  }
   0x5   :  { %s806_s10 = smov 0   ;;  %s808_s11 = smov 0  }
   0x6 LB: > { %s575_s12 = sadd.s32 4294967295, %s782_s11   ;;  %s576_s13 = sadd.s32 4294967294, %s782_s11   ;;  %s782_s11 = sphi %s808_s11, %s17_s11   ;;  %s778_s10 = sphi %s806_s10, %s1025_s10   ;;  %s774_s9 = sphi %s804_s9, %s1024_s9   ;;  %s770_s8 = sphi %s802_s8, %s1023_s8   ;;  %s766_s7 = sphi %s800_s7, %s1022_s7   ;;  %s762_s6 = sphi %s798_s6, %s1021_s6  }
   0x7   : > { %s29_s14 = sadd.s32 1, %s778_s10  ;;  %s38_s15 = sadd.s32 1, %s770_s8 }
   0x8   : > { %p31_p0 = scmp.ge.s32.totalorder %s29_s14, 2  ;;  %p45_p1 = scmp.ne.s32.totalorder %s770_s8, %s766_s7 }
   0x9   : > { %p46_p2 = scmp.eq.s32.totalorder %s782_s11, 0  ;;  %p51_p3 = scmp.ne.s32.totalorder %s766_s7, %s762_s6 }
   0xa   : > { %s1027_s14 = smov (%p31_p0, %s29_s14), 0  ;;  %p52_p5 = scmp.eq.s32.totalorder %s575_s12, 0 }
   0xb   : > { %p839_p4 = por %p46_p2, %p45_p1  ;;  %s33_s17 = ssub.s32 %s778_s10, %s1027_s14 }
   0xc   : > { %p75_p6 = scmp.eq.s32.totalorder %s575_s12, 1  ;;  %p36_p7 = scmp.eq.s32.totalorder %s33_s17, 0 }
   0xd   : > { %p845_p8 = por %p52_p5, %p51_p3  ;;  %p81_p10 = scmp.eq.s32.totalorder %s576_s13, 1 }
   0xe   : > { %p849_p9 = por %p75_p6, %p45_p1  ;;  %p618_p13 = scmp.lt.s32.totalorder %s782_s11, 2 }
   0xf   : > { %s854_s20 = scalar_select %p36_p7, %s770_s8, %s38_s15  }
  0x10   : > { %s1014_s19 = scalar_select %p849_p9, 1, 0 }
  0x11   : > { %p856_p11 = por %p81_p10, %p51_p3  ;;  %s101_s22 = sand.u32 1, %s770_s8  }
  0x12   : > { %s579_s23 = sshll.u32 %s101_s22, 7  ;;  %s605_s24 = sshll.u32 %s778_s10, 11 }
  0x13   : > { %s1015_s21 = scalar_select %p856_p11, 1, 0 }
  0x14   : > { %s867_s27 = scalar_lea.hbm %s1009_s0, %s605_s24  ;;  %s105_s28 = scalar_lea.vmem [#allocation4], %s579_s23 }
  0x15   : > { %s114_s29 = sshll.u32 %s105_s28, 4  ;;  %p873_p0 = pnand %p618_p13, %p839_p4  ;;  %s869_s29 = int_to_ptr.vmem [resolvable:$true] %s114_s29 }
  0x16   : > { %s878_s2 = scalar_lea.sflag [#allocation5], %s101_s22  ;;  %s670_s3 = scalar_lea.hbm %s867_s27, 2048 }
  0x17   : > { %p671_p2 = scmp.ne.s32.totalorder %s867_s27, %s670_s3  ;;  %p672_p3 = pneg %p873_p0 }
  0x18   : > { %s675_s12 = scalar_lea.hbm %s1009_s0, 4096  ;;  %p676_p4 = scmp.lt.u32.totalorder %s867_s27, %s1009_s0 }
  0x19   : > { %p673_p5 = pnand %p672_p3, %p671_p2  ;;  %p677_p7 = scmp.lt.u32.totalorder %s675_s12, %s670_s3 }
  0x1a   : > { %p679_p13 = scmp.lt.u32.totalorder %s670_s3, %s867_s27 }
  0x1b   : > { %p674_p6 = pneg %p673_p5  ;;  %p678_p10 = por %p677_p7, %p676_p4 }
  0x1d   : > { %p680_p12 = por %p679_p13, %p678_p10 }
  0x1f   : > { %p681_p1 = pnand %p680_p12, %p674_p6 }
  0x21   : > { %684 = shalt.err (!%p681_p1)
}
  0x22   : > { %s685_s16 = scalar_lea.vmem %s869_s29, 2048  ;;  %s784_s17 = smov [#allocation4]  }
  0x23   : > { %p686_p2 = scmp.ne.s32.totalorder %s869_s29, %s685_s16  ;;  %s690_s22 = sshll.u32 %s784_s17, 4  ;;  %s691_s22 = int_to_ptr.vmem [resolvable:$false] %s690_s22 }
  0x24   : > { %s692_s23 = scalar_lea.vmem %s691_s22, 4096  ;;  %p693_p9 = scmp.lt.s32.totalorder %s869_s29, %s691_s22 }
  0x25   : > { %p688_p5 = pnand %p686_p2, %p672_p3  ;;  %p694_p4 = scmp.lt.s32.totalorder %s692_s23, %s685_s16 }
  0x27   : > { %p689_p11 = pneg %p688_p5  ;;  %p695_p7 = por %p694_p4, %p693_p9 }
  0x29   : > { %p696_p10 = pnand %p695_p7, %p689_p11 }
  0x2b   : > { %699 = shalt.err (!%p696_p10)
}
  0x2c   : > { %s785_s24 = smov 256   ;;  %s786_s25 = smov 16  }
  0x2d   : > { %613 = dma.hbm_to_vmem [thread:$0]  (!%p873_p0), %s867_s27, 2048, %s869_s29, %s878_s2, %s785_s24, %s785_s24, %s786_s25  }
  0x2e   : > { %p122_p12 = scmp.lt.s32.totalorder %s782_s11, 3  ;;  %p1017_p1 = scmp.ge.s32.totalorder %s782_s11, 1 }
  0x30   : > { %p123_p3 = pnand %p1017_p1, %p122_p12 }
  0x31   : > { %s910_s26 = sand.u32 (!%p123_p3), 1, %s766_s7  }
  0x32   : > { %126 = sbr.rel (%p123_p3) target bundleno = 250 (0xfa), region = 24  ;;  %s583_s28 = sshll.u32 (!%p123_p3), %s910_s26, 7 }
  0x33   : > { %s129_s3 = scalar_lea.sflag (!%p123_p3), [#allocation5], %s910_s26  ;;  %s914_s4 = scalar_lea.vmem (!%p123_p3), [#allocation4], %s583_s28 }
  0x39   : > { %753 = dma.done.wait (%p845_p8), %s129_s3, 2048  }
  0x3a   : > { %755 = vsyncadd (%p845_p8), %s129_s3, 4294965248  ;;  %v278_v0 = vld [vmem:[%s914_s4 + $0x20] sm:$0xff]  ;;  %v595_v1 = vld [vmem:[%s914_s4 + $0x28] sm:$0xff]  ;;  %v373_v34 = vlaneseq  ;;  %vm384_vm0 = vcmask 130112   ;;  %vm391_vm1 = vcmask 195712   ;;  %vm398_vm2 = vcmask 261312  }
  0x3b   : > { %v276_v2 = vld [vmem:[%s914_s4] sm:$0xff]  ;;  %v319_v3 = vadd.f32 %v595_v1, %v278_v0  ;;  %v593_v4 = vld [vmem:[%s914_s4 + $0x8] sm:$0xff]  ;;  %v277_v5 = vld [vmem:[%s914_s4 + $0x10] sm:$0xff]  ;;  %v311_v17 = vmax.f32 %v278_v0, %v595_v1  ;;  %vm405_vm3 = vcmask 326912   ;;  %vm412_vm4 = vcmask 392512   ;;  %s584_s18 = sshll.u32 %s910_s26, 1 }
  0x3c   : > { %v594_v6 = vld [vmem:[%s914_s4 + $0x18] sm:$0xff]  ;;  %v317_v7 = vadd.f32 %v593_v4, %v276_v2  ;;  %v309_v8 = vmax.f32 %v276_v2, %v593_v4  ;;  %v279_v10 = vld [vmem:[%s914_s4 + $0x30] sm:$0xff]  ;;  %v280_v14 = vld [vmem:[%s914_s4 + $0x40] sm:$0xff]  ;;  %v374_v37 = vand.u32 127, %v373_v34  ;;  %v376_v41 = vshrl.u32 %v373_v34, 7  ;;  %s602_s27 = sshll.u32 %s774_s9, 5 }
  0x3d   : > { %345 = vadd.xlane.f32.xlu1 %v319_v3  ;;  %v318_v9 = vadd.f32 %v594_v6, %v277_v5  ;;  %v596_v11 = vld [vmem:[%s914_s4 + $0x38] sm:$0xff]  ;;  %v310_v13 = vmax.f32 %v277_v5, %v594_v6  ;;  %v597_v15 = vld [vmem:[%s914_s4 + $0x48] sm:$0xff]  ;;  %v281_v18 = vld [vmem:[%s914_s4 + $0x50] sm:$0xff]  ;;  %vm419_vm5 = vcmask 458112   ;;  %vm426_vm6 = vcmask 523712   ;;  %s150_s29 = scalar_lea.vmem [#allocation7], %s584_s18  ;;  %s958_s12 = scalar_lea.hbm %s1010_s1, %s602_s27 }
  0x3e   : > { %341 = vadd.xlane.f32.xlu0 %v317_v7  ;;  %v320_v12 = vadd.f32 %v596_v11, %v279_v10  ;;  %v321_v16 = vadd.f32 %v597_v15, %v280_v14  ;;  %v598_v19 = vld [vmem:[%s914_s4 + $0x58] sm:$0xff]  ;;  %v312_v21 = vmax.f32 %v279_v10, %v596_v11  ;;  %v282_v22 = vld [vmem:[%s914_s4 + $0x60] sm:$0xff]  ;;  %v599_v23 = vld [vmem:[%s914_s4 + $0x68] sm:$0xff]  ;;  %v313_v25 = vmax.f32 %v280_v14, %v597_v15  ;;  %s494_s30 = sshll.u32 %s150_s29, 4  ;;  %s481_s9 = scalar_lea.sflag [#allocation6], %s910_s26  ;;  %s960_s30 = int_to_ptr.vmem [resolvable:$true] %s494_s30 }
  0x3f   : > { %v322_v20 = vadd.f32 %v598_v19, %v281_v18  ;;  %v323_v24 = vadd.f32 %v599_v23, %v282_v22  ;;  %v283_v26 = vld [vmem:[%s914_s4 + $0x70] sm:$0xff]  ;;  %v600_v27 = vld [vmem:[%s914_s4 + $0x78] sm:$0xff]  ;;  %v314_v29 = vmax.f32 %v281_v18, %v598_v19  ;;  %v315_v31 = vmax.f32 %v282_v22, %v599_v23  ;;  %s700_s13 = scalar_lea.vmem %s960_s30, 32  ;;  %p1018_p9 = scmp.ne.s32.totalorder %s1014_s19, 0 }
  0x40   : > { %v324_v28 = vadd.f32 %v600_v27, %v283_v26  ;;  %v316_v30 = vmax.f32 %v283_v26, %v600_v27  ;;  %v379_v39 = vadd.s32 4294967288, %v374_v37  ;;  %v386_v43 = vadd.s32 4294967280, %v374_v37  ;;  %p701_p8 = scmp.ne.s32.totalorder %s960_s30, %s700_s13  ;;  %s787_s15 = smov [#allocation7]  }
  0x41   : > { %325 = vmax.xlane.f32.xlu1 %v309_v8  ;;  %v393_v46 = vadd.s32 4294967272, %v374_v37  ;;  %v400_v48 = vadd.s32 4294967264, %v374_v37  ;;  %v377_v49 = vsub.s32 %v374_v37, %v376_v41  ;;  %v407_v51 = vadd.s32 4294967256, %v374_v37  ;;  %s704_s16 = sshll.u32 %s787_s15, 4  ;;  %s705_s16 = int_to_ptr.vmem [resolvable:$false] %s704_s16 }
  0x42   : > { %343 = vadd.xlane.f32.xlu0 %v318_v9  ;;  %v382_v44 = vsub.s32 %v379_v39, %v376_v41  ;;  %v414_v53 = vadd.s32 4294967248, %v374_v37  ;;  %v389_v54 = vsub.s32 %v386_v43, %v376_v41  ;;  %v421_v1 = vadd.s32 4294967240, %v374_v37  ;;  %p702_p11 = pnand %p701_p8, %p1018_p9  ;;  %s706_s17 = scalar_lea.vmem %s705_s16, 64 }
  0x43   : > { %v396_v56 = vsub.s32 %v393_v46, %v376_v41  ;;  %v403_v60 = vsub.s32 %v400_v48, %v376_v41  ;;  %v410_v63 = vsub.s32 %v407_v51, %v376_v41  ;;  %vm429_vm7 = vcmask 516096   ;;  %p707_p6 = scmp.lt.s32.totalorder %s960_s30, %s705_s16  ;;  %p708_p13 = scmp.lt.s32.totalorder %s706_s17, %s700_s13 }
  0x44   : > { %v417_v2 = vsub.s32 %v414_v53, %v376_v41  ;;  %p703_p0 = pneg %p702_p11 }
  0x45   : > { %347 = vadd.xlane.f32.xlu1 %v320_v12  ;;  %v424_v12 = vsub.s32 %v421_v1, %v376_v41  ;;  %p709_p2 = por %p708_p13, %p707_p6 }
  0x46   : > { %327 = vmax.xlane.f32.xlu0 %v310_v13 }
  0x47   : > { %p710_p5 = pnand %p709_p2, %p703_p0 }
  0x49   : > { %349 = vadd.xlane.f32.xlu1 %v321_v16 }
  0x4a   : > { %329 = vmax.xlane.f32.xlu0 %v311_v17 }
  0x4d   : > { %351 = vadd.xlane.f32.xlu1 %v322_v20 }
  0x4e   : > { %331 = vmax.xlane.f32.xlu0 %v312_v21 }
  0x51   : > { %353 = vadd.xlane.f32.xlu1 %v323_v24 }
  0x52   : > { %333 = vmax.xlane.f32.xlu0 %v313_v25 }
  0x55   : > { %355 = vadd.xlane.f32.xlu1 %v324_v28 }
  0x56   : > { %335 = vmax.xlane.f32.xlu0 %v314_v29 }
  0x59   : > { %339 = vmax.xlane.f32.xlu1 %v316_v30 }
  0x5a   : > { %337 = vmax.xlane.f32.xlu0 %v315_v31 }
  0xca   : > { %v346_v32 = vpop.xlane.xlu1 %345 }
  0xcb   : > { %v342_v33 = vpop.xlane.xlu0 %341  ;;  %v359_v59 = vmul.f32 0.00390625, %v346_v32 }
  0xcc   : > { %v357_v50 = vmul.f32 0.00390625, %v342_v33 }
  0xcd   : > { %v451_v8 = vrot.slane %v359_v59, %v389_v54 }
  0xce   : > { %v936_v35 = vpop.xlane.xlu1 %325  ;;  %v442_v62 = vrot.slane %v357_v50, %v377_v49 }
  0xcf   : > { %v344_v36 = vpop.xlane.xlu0 %343  ;;  %v378_v17 = vrot.slane %v936_v35, %v377_v49 }
  0xd0   : > { %v358_v45 = vmul.f32 0.00390625, %v344_v36 }
  0xd2   : > { %v348_v38 = vpop.xlane.xlu1 %347  ;;  %v446_v55 = vrot.slane %v358_v45, %v382_v44 }
  0xd3   : > { %v328_v40 = vpop.xlane.xlu0 %327  ;;  %v360_v57 = vmul.f32 0.00390625, %v348_v38 }
  0xd4   : > { %v447_v4 = vsel %vm384_vm0, %v446_v55, %v442_v62  ;;  %v383_v10 = vrot.slane %v328_v40, %v382_v44 }
  0xd5   : > { %v456_v5 = vrot.slane %v360_v57, %v396_v56  ;;  %v452_v13 = vsel %vm391_vm1, %v451_v8, %v447_v4 }
  0xd6   : > { %v350_v42 = vpop.xlane.xlu1 %349  ;;  %v385_v24 = vsel %vm384_vm0, %v383_v10, %v378_v17 }
  0xd7   : > { %v330_v47 = vpop.xlane.xlu0 %329  ;;  %v361_v61 = vmul.f32 0.00390625, %v350_v42  ;;  %v457_v18 = vsel %vm398_vm2, %v456_v5, %v452_v13 }
  0xd8   : > { %v390_v14 = vrot.slane %v330_v47, %v389_v54 }
  0xd9   : > { %v461_v9 = vrot.slane %v361_v61, %v403_v60 }
  0xda   : > { %v352_v52 = vpop.xlane.xlu1 %351  ;;  %v392_v28 = vsel %vm391_vm1, %v390_v14, %v385_v24 }
  0xdb   : > { %v332_v58 = vpop.xlane.xlu0 %331  ;;  %v362_v0 = vmul.f32 0.00390625, %v352_v52  ;;  %v462_v22 = vsel %vm405_vm3, %v461_v9, %v457_v18 }
  0xdc   : > { %v397_v19 = vrot.slane %v332_v58, %v396_v56 }
  0xdd   : > { %v466_v11 = vrot.slane %v362_v0, %v410_v63 }
  0xde   : > { %v354_v3 = vpop.xlane.xlu1 %353  ;;  %v399_v31 = vsel %vm398_vm2, %v397_v19, %v392_v28 }
  0xdf   : > { %v334_v6 = vpop.xlane.xlu0 %333  ;;  %v363_v7 = vmul.f32 0.00390625, %v354_v3  ;;  %v467_v25 = vsel %vm412_vm4, %v466_v11, %v462_v22 }
  0xe0   : > { %v404_v23 = vrot.slane %v334_v6, %v403_v60 }
  0xe1   : > { %v471_v15 = vrot.slane %v363_v7, %v417_v2 }
  0xe2   : > { %v356_v16 = vpop.xlane.xlu1 %355  ;;  %v406_v35 = vsel %vm405_vm3, %v404_v23, %v399_v31 }
  0xe3   : > { %v336_v20 = vpop.xlane.xlu0 %335  ;;  %v364_v21 = vmul.f32 0.00390625, %v356_v16  ;;  %v472_v29 = vsel %vm419_vm5, %v471_v15, %v467_v25 }
  0xe4   : > { %v411_v26 = vrot.slane %v336_v20, %v410_v63 }
  0xe5   : > { %v476_v27 = vrot.slane %v364_v21, %v424_v12 }
  0xe6   : > { %v340_v30 = vpop.xlane.xlu1 %339  ;;  %v413_v37 = vsel %vm412_vm4, %v411_v26, %v406_v35 }
  0xe7   : > { %v477_v32 = vsel %vm426_vm6, %v476_v27, %v472_v29  ;;  %v338_v33 = vpop.xlane.xlu0 %337  ;;  %v425_v34 = vrot.slane %v340_v30, %v424_v12 }
  0xe8   : > { %v418_v36 = vrot.slane %v338_v33, %v417_v2  ;;  %479 = vst.msk [vmem:[%s150_s29 + $0x1] sm:$0x1] %vm429_vm7, %v477_v32 }
  0xea   : > { %v420_v38 = vsel %vm419_vm5, %v418_v36, %v413_v37 }
  0xeb   : > { %v427_v39 = vsel %vm426_vm6, %v425_v34, %v420_v38 }
  0xec   : > { %430 = vst.msk [vmem:[%s150_s29] sm:$0x1] %vm429_vm7, %v427_v39 }
  0xed   : > { %713 = shalt.err (!%p710_p5)
}
  0xee   : > { %s714_s22 = scalar_lea.hbm %s958_s12, 32  ;;  %s718_s25 = scalar_lea.hbm %s1010_s1, 64 }
  0xef   : > { %p715_p4 = scmp.ne.s32.totalorder %s958_s12, %s714_s22  ;;  %p719_p12 = scmp.lt.u32.totalorder %s958_s12, %s1010_s1 }
  0xf0   : > { %p720_p1 = scmp.lt.u32.totalorder %s718_s25, %s714_s22  ;;  %p722_p8 = scmp.lt.u32.totalorder %s714_s22, %s958_s12 }
  0xf1   : > { %p716_p7 = pnand %p715_p4, %p1018_p9 }
  0xf2   : > { %p721_p3 = por %p720_p1, %p719_p12 }
  0xf3   : > { %p717_p10 = pneg %p716_p7 }
  0xf4   : > { %p723_p11 = por %p722_p8, %p721_p3 }
  0xf6   : > { %p724_p0 = pnand %p723_p11, %p717_p10 }
  0xf8   : > { %727 = shalt.err (!%p724_p0)
}
  0xf9   : > { %608 = dma.vmem_to_hbm [thread:$0]  (%p1018_p9), %s960_s30, 32, %s958_s12, %s481_s9  }
  0xfa PF: > { %s506_s3 = sand.u32 1, %s762_s6   ;;  %p1019_p6 = scmp.ne.s32.totalorder %s1015_s21, 0 }
  0xfb   : > { %p1020_p13 = scmp.ge.s32.totalorder %s782_s11, 2  ;;  %s507_s4 = scalar_lea.sflag [#allocation6], %s506_s3 }
  0xfd   : > { %p615_p2 = pnand %p1020_p13, %p1019_p6 }
  0xff   : > { %757 = dma.done.wait (!%p615_p2), %s507_s4, 32  }
 0x100   : > { %759 = vsyncadd (!%p615_p2), %s507_s4, 4294967264  ;;  %s17_s11 = sadd.s32 1, %s782_s11   ;;  %s1021_s6 = smov %s766_s7 }
 0x101   : > { %p14_p5 = scmp.ge.s32.totalorder %s17_s11, 4   ;;  %s1022_s7 = smov %s770_s8 }
 0x102   : > { %s1023_s8 = smov %s854_s20  ;;  %s1024_s9 = smov %s778_s10 }
 0x103   : > { %s1025_s10 = smov %s1027_s14  ;;  %16 = sbr.rel (!%p14_p5) target bundleno = 6 (0x6), region = 83 }
 0x10a   :  { %512 = vsyncpa [#allocation5], 1 }
 0x10b   :  { %514 = vsyncpa [#allocation5 + $0x1], 1 }
 0x10c   :  { %515 = vsyncpa [#allocation6], 1 }
 0x10d   :  { %517 = vsyncpa [#allocation6 + $0x1], 1 }

</bundles_post_ra>
